<compile_context>
chip_gen: v7x
topology: tpu7x:2x2x1
jax: 0.10.0
libtpu: 0.0.40
codegen_flags: <defaults>
</compile_context>

<pallas_src>
import functools

import jax
import jax.numpy as jnp
from jax import lax
from jax.experimental import pallas as pl
from jax.experimental.pallas import tpu as pltpu

PAD = 3                  # max dilation -> padding needed on each side
DILATIONS = (1, 2, 3)


def _spatial_attention2_kernel(w_ref, b_ref, x_ref, o_ref, pad_ref, *, H, W):
    """One (Bt batch images, Ct channels) block per grid step.

    w_ref:  SMEM (27,)  -- 3 convs x 3x3 weights, flattened [conv, ki, kj]
    b_ref:  SMEM (3,)   -- 3 conv biases
    x_ref:  VMEM (Bt, Ct, H, W)
    o_ref:  VMEM (Bt, 1, H, W)   (same block across the channel grid axis)
    pad_ref: VMEM scratch (Bt, H + 2*PAD, W + 2*PAD), persistent zero borders
    """
    c = pl.program_id(1)
    last_c = pl.num_programs(1) - 1

    # Channel max of this chunk. Keep the explicit f32 upcast (v5e has no bf16
    # VPU/EUP); it is a no-op for f32 inputs.
    x = x_ref[...].astype(jnp.float32)          # (Bt, Ct, H, W)
    chunk_max = jnp.max(x, axis=1)              # (Bt, H, W)

    @pl.when(c == 0)
    def _init():
        # Single zeroing pass per batch block: borders stay zero for the whole
        # block ("same" padding); the interior gets the first chunk's max.
        pad_ref[...] = jnp.zeros_like(pad_ref)
        pad_ref[:, PAD:PAD + H, PAD:PAD + W] = chunk_max

    @pl.when(c > 0)
    def _accumulate():
        pad_ref[:, PAD:PAD + H, PAD:PAD + W] = jnp.maximum(
            pad_ref[:, PAD:PAD + H, PAD:PAD + W], chunk_max)

    @pl.when(c == last_c)
    def _finalize():
        # Three chained dilated 3x3 convs on the (zero-padded) channel max,
        # then sigmoid. 9 taps per conv, grouped into 3 independent row sums.
        for ci, d in enumerate(DILATIONS):
            row_sums = []
            for ki in range(3):
                r0 = PAD + (ki - 1) * d
                row_acc = None
                for kj in range(3):
                    c0 = PAD + (kj - 1) * d
                    w = w_ref[ci * 9 + ki * 3 + kj]
                    tap = pad_ref[:, r0:r0 + H, c0:c0 + W]
                    term = w * tap
                    row_acc = term if row_acc is None else row_acc + term
                row_sums.append(row_acc)
            acc = (row_sums[0] + row_sums[1]) + (row_sums[2] + b_ref[ci])

            if ci + 1 < len(DILATIONS):
                # Feed the next conv: rewrite the interior only; borders stay 0.
                pad_ref[:, PAD:PAD + H, PAD:PAD + W] = acc
            else:
                o_ref[:, 0, :, :] = jax.nn.sigmoid(acc).astype(o_ref.dtype)


def _largest_divisor_leq(n, cap):
    cap = max(1, min(n, cap))
    for d in range(cap, 0, -1):
        if n % d == 0:
            return d
    return 1


def spatial_attention2(x, weights, biases, *, block_bytes=4 * 1024 * 1024):
    """x: (B, C, H, W) f32. weights: (3, 1, 1, 3, 3). biases: (3, 1)."""
    B, C, H, W = x.shape
    w_flat = weights.reshape(27).astype(jnp.float32)
    b_flat = biases.reshape(3).astype(jnp.float32)

    # Batch-block a handful of images per grid step (amortize per-step cost),
    # then size the channel chunk against an explicit VMEM budget so the
    # double-buffered input block stays small on every generation
    # (v7x: 64 MiB physical / 32 MiB scoped VMEM).
    Bt = _largest_divisor_leq(B, 8)
    ct_cap = max(1, block_bytes // (Bt * H * W * 4))
    Ct = _largest_divisor_leq(C, ct_cap)

    kernel = functools.partial(_spatial_attention2_kernel, H=H, W=W)

    return pl.pallas_call(
        kernel,
        out_shape=jax.ShapeDtypeStruct((B, 1, H, W), jnp.float32),
        grid_spec=pltpu.PrefetchScalarGridSpec(
            num_scalar_prefetch=0,
            grid=(B // Bt, C // Ct),
            in_specs=[
                pl.BlockSpec(memory_space=pltpu.MemorySpace.SMEM),     # weights
                pl.BlockSpec(memory_space=pltpu.MemorySpace.SMEM),     # biases
                pl.BlockSpec((Bt, Ct, H, W), lambda b, c: (b, c, 0, 0)),
            ],
            out_specs=pl.BlockSpec((Bt, 1, H, W), lambda b, c: (b, 0, 0, 0)),
            scratch_shapes=[
                pltpu.VMEM((Bt, H + 2 * PAD, W + 2 * PAD), jnp.float32)],
        ),
        compiler_params=pltpu.CompilerParams(
            dimension_semantics=("parallel", "arbitrary"),
            vmem_limit_bytes=32 * 1024 * 1024),
    )(w_flat, b_flat, x)


def _reference(x, weights, biases):
    """Pure-JAX reference matching the PyTorch forward."""
    y = jnp.max(x, axis=1, keepdims=True)     # (B, 1, H, W)
    for ci, d in enumerate(DILATIONS):
        w = weights[ci]                       # (1, 1, 3, 3) OIHW
        b = biases[ci]                        # (1,)
        y = lax.conv_general_dilated(
            y, w,
            window_strides=(1, 1),
            padding=((d, d), (d, d)),
            rhs_dilation=(d, d),
            dimension_numbers=("NCHW", "OIHW", "NCHW"),
        ) + b[None, :, None, None]
    return jax.nn.sigmoid(y)


if __name__ == "__main__":
    key = jax.random.PRNGKey(0)
    kx, kw, kb = jax.random.split(key, 3)

    B, C, H, W = 2, 4, 16, 16
    x = jax.random.normal(kx, (B, C, H, W), dtype=jnp.float32)

    # Deterministic synthetic parameters for the three 1->1 3x3 convs
    # (PyTorch shapes: weight (1,1,3,3), bias (1,) per conv).
    fan_in = 1 * 3 * 3
    bound = 1.0 / (fan_in ** 0.5)
    weights = jax.random.uniform(kw, (3, 1, 1, 3, 3), jnp.float32,
                                 minval=-bound, maxval=bound)
    biases = jax.random.uniform(kb, (3, 1), jnp.float32,
                                minval=-bound, maxval=bound)

    out = spatial_attention2(x, weights, biases)
    out = jax.block_until_ready(out)

    ref = _reference(x, weights, biases)
    assert out.shape == (B, 1, H, W), out.shape
    assert jnp.allclose(out, ref, atol=1e-5, rtol=1e-5), (
        float(jnp.max(jnp.abs(out - ref))))

    print("KERNEL_OK")
</pallas_src>

<mosaic_0001>
module attributes {stable_mosaic.version = 11 : i64} {
  func.func @_spatial_attention2_kernel(%arg0: i32, %arg1: i32, %arg2: memref<27xf32, #tpu.memory_space<smem>>, %arg3: memref<3xf32, #tpu.memory_space<smem>>, %arg4: memref<2x4x16x16xf32, #tpu.memory_space<vmem>>, %arg5: memref<2x1x16x16xf32, #tpu.memory_space<vmem>>, %arg6: memref<2x22x22xf32, #tpu.memory_space<vmem>>) attributes {dimension_semantics = [#tpu.dimension_semantics<parallel>, #tpu.dimension_semantics<arbitrary>], iteration_bounds = array<i64: 1, 1>, scalar_prefetch = 0 : i64, scratch_operands = 1 : i64, tpu.core_type = #tpu.core_type<tc>, window_params = [{transform_indices = @transform_0, window_bounds = array<i64: 27>}, {transform_indices = @transform_1, window_bounds = array<i64: 3>}, {transform_indices = @transform_2, window_bounds = array<i64: 2, 4, 16, 16>}, {transform_indices = @transform_3, window_bounds = array<i64: 2, 1, 16, 16>}]} {
    %c0 = arith.constant 0 : index
    %c0_0 = arith.constant 0 : index
    %c0_1 = arith.constant 0 : index
    %c0_2 = arith.constant 0 : index
    %0 = vector.load %arg4[%c0, %c0_0, %c0_1, %c0_2] : memref<2x4x16x16xf32, #tpu.memory_space<vmem>>, vector<2x4x16x16xf32>
    %cst = arith.constant dense<0xFF800000> : vector<2x16x16xf32>
    %1 = vector.multi_reduction <maximumf>, %0, %cst [1] : vector<2x4x16x16xf32> to vector<2x16x16xf32>
    %c0_i32 = arith.constant 0 : i32
    %2 = arith.cmpi eq, %arg1, %c0_i32 : i32
    %3 = arith.extui %2 : i1 to i32
    %c0_i32_3 = arith.constant 0 : i32
    %4 = arith.cmpi ne, %3, %c0_i32_3 : i32
    scf.if %4 {
      %cst_8 = arith.constant 0.000000e+00 : f32
      %11 = vector.broadcast %cst_8 : f32 to vector<2x22x22xf32>
      %c0_9 = arith.constant 0 : index
      %c0_10 = arith.constant 0 : index
      %c0_11 = arith.constant 0 : index
      %12 = vector.load %arg6[%c0_9, %c0_10, %c0_11] : memref<2x22x22xf32, #tpu.memory_space<vmem>>, vector<2x22x22xf32>
      tpu.vector_store %arg6[%c0_9, %c0_10, %c0_11], %11 {strides = array<i32>} : memref<2x22x22xf32, #tpu.memory_space<vmem>>, vector<2x22x22xf32>,
      %c0_12 = arith.constant 0 : index
      %c3 = arith.constant 3 : index
      %c3_13 = arith.constant 3 : index
      %13 = vector.load %arg6[%c0_12, %c3, %c3_13] : memref<2x22x22xf32, #tpu.memory_space<vmem>>, vector<2x16x16xf32>
      tpu.vector_store %arg6[%c0_12, %c3, %c3_13], %1 {strides = array<i32>} : memref<2x22x22xf32, #tpu.memory_space<vmem>>, vector<2x16x16xf32>,
    } else {
    }
    %c0_i32_4 = arith.constant 0 : i32
    %5 = arith.cmpi sgt, %arg1, %c0_i32_4 : i32
    %6 = arith.extui %5 : i1 to i32
    %c0_i32_5 = arith.constant 0 : i32
    %7 = arith.cmpi ne, %6, %c0_i32_5 : i32
    scf.if %7 {
      %c0_8 = arith.constant 0 : index
      %c3 = arith.constant 3 : index
      %c3_9 = arith.constant 3 : index
      %11 = vector.load %arg6[%c0_8, %c3, %c3_9] : memref<2x22x22xf32, #tpu.memory_space<vmem>>, vector<2x16x16xf32>
      %12 = arith.maximumf %11, %1 : vector<2x16x16xf32>
      %c0_10 = arith.constant 0 : index
      %c3_11 = arith.constant 3 : index
      %c3_12 = arith.constant 3 : index
      %13 = vector.load %arg6[%c0_10, %c3_11, %c3_12] : memref<2x22x22xf32, #tpu.memory_space<vmem>>, vector<2x16x16xf32>
      tpu.vector_store %arg6[%c0_10, %c3_11, %c3_12], %12 {strides = array<i32>} : memref<2x22x22xf32, #tpu.memory_space<vmem>>, vector<2x16x16xf32>,
    } else {
    }
    %c0_i32_6 = arith.constant 0 : i32
    %8 = arith.cmpi eq, %arg1, %c0_i32_6 : i32
    %9 = arith.extui %8 : i1 to i32
    %c0_i32_7 = arith.constant 0 : i32
    %10 = arith.cmpi ne, %9, %c0_i32_7 : i32
    scf.if %10 {
      %c0_8 = arith.constant 0 : index
      %11 = memref.load %arg2[%c0_8] : memref<27xf32, #tpu.memory_space<smem>>
      %c0_9 = arith.constant 0 : index
      %c2 = arith.constant 2 : index
      %c2_10 = arith.constant 2 : index
      %12 = vector.load %arg6[%c0_9, %c2, %c2_10] : memref<2x22x22xf32, #tpu.memory_space<vmem>>, vector<2x16x16xf32>
      %13 = vector.broadcast %11 : f32 to vector<2x16x16xf32>
      %14 = arith.mulf %13, %12 : vector<2x16x16xf32>
      %c1 = arith.constant 1 : index
      %15 = memref.load %arg2[%c1] : memref<27xf32, #tpu.memory_space<smem>>
      %c0_11 = arith.constant 0 : index
      %c2_12 = arith.constant 2 : index
      %c3 = arith.constant 3 : index
      %16 = vector.load %arg6[%c0_11, %c2_12, %c3] : memref<2x22x22xf32, #tpu.memory_space<vmem>>, vector<2x16x16xf32>
      %17 = vector.broadcast %15 : f32 to vector<2x16x16xf32>
      %18 = arith.mulf %17, %16 : vector<2x16x16xf32>
      %19 = arith.addf %14, %18 : vector<2x16x16xf32>
      %c2_13 = arith.constant 2 : index
      %20 = memref.load %arg2[%c2_13] : memref<27xf32, #tpu.memory_space<smem>>
      %c0_14 = arith.constant 0 : index
      %c2_15 = arith.constant 2 : index
      %c4 = arith.constant 4 : index
      %21 = vector.load %arg6[%c0_14, %c2_15, %c4] : memref<2x22x22xf32, #tpu.memory_space<vmem>>, vector<2x16x16xf32>
      %22 = vector.broadcast %20 : f32 to vector<2x16x16xf32>
      %23 = arith.mulf %22, %21 : vector<2x16x16xf32>
      %24 = arith.addf %19, %23 : vector<2x16x16xf32>
      %c3_16 = arith.constant 3 : index
      %25 = memref.load %arg2[%c3_16] : memref<27xf32, #tpu.memory_space<smem>>
      %c0_17 = arith.constant 0 : index
      %c3_18 = arith.constant 3 : index
      %c2_19 = arith.constant 2 : index
      %26 = vector.load %arg6[%c0_17, %c3_18, %c2_19] : memref<2x22x22xf32, #tpu.memory_space<vmem>>, vector<2x16x16xf32>
      %27 = vector.broadcast %25 : f32 to vector<2x16x16xf32>
      %28 = arith.mulf %27, %26 : vector<2x16x16xf32>
      %c4_20 = arith.constant 4 : index
      %29 = memref.load %arg2[%c4_20] : memref<27xf32, #tpu.memory_space<smem>>
      %c0_21 = arith.constant 0 : index
      %c3_22 = arith.constant 3 : index
      %c3_23 = arith.constant 3 : index
      %30 = vector.load %arg6[%c0_21, %c3_22, %c3_23] : memref<2x22x22xf32, #tpu.memory_space<vmem>>, vector<2x16x16xf32>
      %31 = vector.broadcast %29 : f32 to vector<2x16x16xf32>
      %32 = arith.mulf %31, %30 : vector<2x16x16xf32>
      %33 = arith.addf %28, %32 : vector<2x16x16xf32>
      %c5 = arith.constant 5 : index
      %34 = memref.load %arg2[%c5] : memref<27xf32, #tpu.memory_space<smem>>
      %c0_24 = arith.constant 0 : index
      %c3_25 = arith.constant 3 : index
      %c4_26 = arith.constant 4 : index
      %35 = vector.load %arg6[%c0_24, %c3_25, %c4_26] : memref<2x22x22xf32, #tpu.memory_space<vmem>>, vector<2x16x16xf32>
      %36 = vector.broadcast %34 : f32 to vector<2x16x16xf32>
      %37 = arith.mulf %36, %35 : vector<2x16x16xf32>
      %38 = arith.addf %33, %37 : vector<2x16x16xf32>
      %c6 = arith.constant 6 : index
      %39 = memref.load %arg2[%c6] : memref<27xf32, #tpu.memory_space<smem>>
      %c0_27 = arith.constant 0 : index
      %c4_28 = arith.constant 4 : index
      %c2_29 = arith.constant 2 : index
      %40 = vector.load %arg6[%c0_27, %c4_28, %c2_29] : memref<2x22x22xf32, #tpu.memory_space<vmem>>, vector<2x16x16xf32>
      %41 = vector.broadcast %39 : f32 to vector<2x16x16xf32>
      %42 = arith.mulf %41, %40 : vector<2x16x16xf32>
      %c7 = arith.constant 7 : index
      %43 = memref.load %arg2[%c7] : memref<27xf32, #tpu.memory_space<smem>>
      %c0_30 = arith.constant 0 : index
      %c4_31 = arith.constant 4 : index
      %c3_32 = arith.constant 3 : index
      %44 = vector.load %arg6[%c0_30, %c4_31, %c3_32] : memref<2x22x22xf32, #tpu.memory_space<vmem>>, vector<2x16x16xf32>
      %45 = vector.broadcast %43 : f32 to vector<2x16x16xf32>
      %46 = arith.mulf %45, %44 : vector<2x16x16xf32>
      %47 = arith.addf %42, %46 : vector<2x16x16xf32>
      %c8 = arith.constant 8 : index
      %48 = memref.load %arg2[%c8] : memref<27xf32, #tpu.memory_space<smem>>
      %c0_33 = arith.constant 0 : index
      %c4_34 = arith.constant 4 : index
      %c4_35 = arith.constant 4 : index
      %49 = vector.load %arg6[%c0_33, %c4_34, %c4_35] : memref<2x22x22xf32, #tpu.memory_space<vmem>>, vector<2x16x16xf32>
      %50 = vector.broadcast %48 : f32 to vector<2x16x16xf32>
      %51 = arith.mulf %50, %49 : vector<2x16x16xf32>
      %52 = arith.addf %47, %51 : vector<2x16x16xf32>
      %53 = arith.addf %24, %38 : vector<2x16x16xf32>
      %c0_36 = arith.constant 0 : index
      %54 = memref.load %arg3[%c0_36] : memref<3xf32, #tpu.memory_space<smem>>
      %55 = vector.broadcast %54 : f32 to vector<2x16x16xf32>
      %56 = arith.addf %52, %55 : vector<2x16x16xf32>
      %57 = arith.addf %53, %56 : vector<2x16x16xf32>
      %c0_37 = arith.constant 0 : index
      %c3_38 = arith.constant 3 : index
      %c3_39 = arith.constant 3 : index
      %58 = vector.load %arg6[%c0_37, %c3_38, %c3_39] : memref<2x22x22xf32, #tpu.memory_space<vmem>>, vector<2x16x16xf32>
      tpu.vector_store %arg6[%c0_37, %c3_38, %c3_39], %57 {strides = array<i32>} : memref<2x22x22xf32, #tpu.memory_space<vmem>>, vector<2x16x16xf32>,
      %c9 = arith.constant 9 : index
      %59 = memref.load %arg2[%c9] : memref<27xf32, #tpu.memory_space<smem>>
      %c0_40 = arith.constant 0 : index
      %c1_41 = arith.constant 1 : index
      %c1_42 = arith.constant 1 : index
      %60 = vector.load %arg6[%c0_40, %c1_41, %c1_42] : memref<2x22x22xf32, #tpu.memory_space<vmem>>, vector<2x16x16xf32>
      %61 = vector.broadcast %59 : f32 to vector<2x16x16xf32>
      %62 = arith.mulf %61, %60 : vector<2x16x16xf32>
      %c10 = arith.constant 10 : index
      %63 = memref.load %arg2[%c10] : memref<27xf32, #tpu.memory_space<smem>>
      %c0_43 = arith.constant 0 : index
      %c1_44 = arith.constant 1 : index
      %c3_45 = arith.constant 3 : index
      %64 = vector.load %arg6[%c0_43, %c1_44, %c3_45] : memref<2x22x22xf32, #tpu.memory_space<vmem>>, vector<2x16x16xf32>
      %65 = vector.broadcast %63 : f32 to vector<2x16x16xf32>
      %66 = arith.mulf %65, %64 : vector<2x16x16xf32>
      %67 = arith.addf %62, %66 : vector<2x16x16xf32>
      %c11 = arith.constant 11 : index
      %68 = memref.load %arg2[%c11] : memref<27xf32, #tpu.memory_space<smem>>
      %c0_46 = arith.constant 0 : index
      %c1_47 = arith.constant 1 : index
      %c5_48 = arith.constant 5 : index
      %69 = vector.load %arg6[%c0_46, %c1_47, %c5_48] : memref<2x22x22xf32, #tpu.memory_space<vmem>>, vector<2x16x16xf32>
      %70 = vector.broadcast %68 : f32 to vector<2x16x16xf32>
      %71 = arith.mulf %70, %69 : vector<2x16x16xf32>
      %72 = arith.addf %67, %71 : vector<2x16x16xf32>
      %c12 = arith.constant 12 : index
      %73 = memref.load %arg2[%c12] : memref<27xf32, #tpu.memory_space<smem>>
      %c0_49 = arith.constant 0 : index
      %c3_50 = arith.constant 3 : index
      %c1_51 = arith.constant 1 : index
      %74 = vector.load %arg6[%c0_49, %c3_50, %c1_51] : memref<2x22x22xf32, #tpu.memory_space<vmem>>, vector<2x16x16xf32>
      %75 = vector.broadcast %73 : f32 to vector<2x16x16xf32>
      %76 = arith.mulf %75, %74 : vector<2x16x16xf32>
      %c13 = arith.constant 13 : index
      %77 = memref.load %arg2[%c13] : memref<27xf32, #tpu.memory_space<smem>>
      %c0_52 = arith.constant 0 : index
      %c3_53 = arith.constant 3 : index
      %c3_54 = arith.constant 3 : index
      %78 = vector.load %arg6[%c0_52, %c3_53, %c3_54] : memref<2x22x22xf32, #tpu.memory_space<vmem>>, vector<2x16x16xf32>
      %79 = vector.broadcast %77 : f32 to vector<2x16x16xf32>
      %80 = arith.mulf %79, %78 : vector<2x16x16xf32>
      %81 = arith.addf %76, %80 : vector<2x16x16xf32>
      %c14 = arith.constant 14 : index
      %82 = memref.load %arg2[%c14] : memref<27xf32, #tpu.memory_space<smem>>
      %c0_55 = arith.constant 0 : index
      %c3_56 = arith.constant 3 : index
      %c5_57 = arith.constant 5 : index
      %83 = vector.load %arg6[%c0_55, %c3_56, %c5_57] : memref<2x22x22xf32, #tpu.memory_space<vmem>>, vector<2x16x16xf32>
      %84 = vector.broadcast %82 : f32 to vector<2x16x16xf32>
      %85 = arith.mulf %84, %83 : vector<2x16x16xf32>
      %86 = arith.addf %81, %85 : vector<2x16x16xf32>
      %c15 = arith.constant 15 : index
      %87 = memref.load %arg2[%c15] : memref<27xf32, #tpu.memory_space<smem>>
      %c0_58 = arith.constant 0 : index
      %c5_59 = arith.constant 5 : index
      %c1_60 = arith.constant 1 : index
      %88 = vector.load %arg6[%c0_58, %c5_59, %c1_60] : memref<2x22x22xf32, #tpu.memory_space<vmem>>, vector<2x16x16xf32>
      %89 = vector.broadcast %87 : f32 to vector<2x16x16xf32>
      %90 = arith.mulf %89, %88 : vector<2x16x16xf32>
      %c16 = arith.constant 16 : index
      %91 = memref.load %arg2[%c16] : memref<27xf32, #tpu.memory_space<smem>>
      %c0_61 = arith.constant 0 : index
      %c5_62 = arith.constant 5 : index
      %c3_63 = arith.constant 3 : index
      %92 = vector.load %arg6[%c0_61, %c5_62, %c3_63] : memref<2x22x22xf32, #tpu.memory_space<vmem>>, vector<2x16x16xf32>
      %93 = vector.broadcast %91 : f32 to vector<2x16x16xf32>
      %94 = arith.mulf %93, %92 : vector<2x16x16xf32>
      %95 = arith.addf %90, %94 : vector<2x16x16xf32>
      %c17 = arith.constant 17 : index
      %96 = memref.load %arg2[%c17] : memref<27xf32, #tpu.memory_space<smem>>
      %c0_64 = arith.constant 0 : index
      %c5_65 = arith.constant 5 : index
      %c5_66 = arith.constant 5 : index
      %97 = vector.load %arg6[%c0_64, %c5_65, %c5_66] : memref<2x22x22xf32, #tpu.memory_space<vmem>>, vector<2x16x16xf32>
      %98 = vector.broadcast %96 : f32 to vector<2x16x16xf32>
      %99 = arith.mulf %98, %97 : vector<2x16x16xf32>
      %100 = arith.addf %95, %99 : vector<2x16x16xf32>
      %101 = arith.addf %72, %86 : vector<2x16x16xf32>
      %c1_67 = arith.constant 1 : index
      %102 = memref.load %arg3[%c1_67] : memref<3xf32, #tpu.memory_space<smem>>
      %103 = vector.broadcast %102 : f32 to vector<2x16x16xf32>
      %104 = arith.addf %100, %103 : vector<2x16x16xf32>
      %105 = arith.addf %101, %104 : vector<2x16x16xf32>
      %c0_68 = arith.constant 0 : index
      %c3_69 = arith.constant 3 : index
      %c3_70 = arith.constant 3 : index
      %106 = vector.load %arg6[%c0_68, %c3_69, %c3_70] : memref<2x22x22xf32, #tpu.memory_space<vmem>>, vector<2x16x16xf32>
      tpu.vector_store %arg6[%c0_68, %c3_69, %c3_70], %105 {strides = array<i32>} : memref<2x22x22xf32, #tpu.memory_space<vmem>>, vector<2x16x16xf32>,
      %c18 = arith.constant 18 : index
      %107 = memref.load %arg2[%c18] : memref<27xf32, #tpu.memory_space<smem>>
      %c0_71 = arith.constant 0 : index
      %c0_72 = arith.constant 0 : index
      %c0_73 = arith.constant 0 : index
      %108 = vector.load %arg6[%c0_71, %c0_72, %c0_73] : memref<2x22x22xf32, #tpu.memory_space<vmem>>, vector<2x16x16xf32>
      %109 = vector.broadcast %107 : f32 to vector<2x16x16xf32>
      %110 = arith.mulf %109, %108 : vector<2x16x16xf32>
      %c19 = arith.constant 19 : index
      %111 = memref.load %arg2[%c19] : memref<27xf32, #tpu.memory_space<smem>>
      %c0_74 = arith.constant 0 : index
      %c0_75 = arith.constant 0 : index
      %c3_76 = arith.constant 3 : index
      %112 = vector.load %arg6[%c0_74, %c0_75, %c3_76] : memref<2x22x22xf32, #tpu.memory_space<vmem>>, vector<2x16x16xf32>
      %113 = vector.broadcast %111 : f32 to vector<2x16x16xf32>
      %114 = arith.mulf %113, %112 : vector<2x16x16xf32>
      %115 = arith.addf %110, %114 : vector<2x16x16xf32>
      %c20 = arith.constant 20 : index
      %116 = memref.load %arg2[%c20] : memref<27xf32, #tpu.memory_space<smem>>
      %c0_77 = arith.constant 0 : index
      %c0_78 = arith.constant 0 : index
      %c6_79 = arith.constant 6 : index
      %117 = vector.load %arg6[%c0_77, %c0_78, %c6_79] : memref<2x22x22xf32, #tpu.memory_space<vmem>>, vector<2x16x16xf32>
      %118 = vector.broadcast %116 : f32 to vector<2x16x16xf32>
      %119 = arith.mulf %118, %117 : vector<2x16x16xf32>
      %120 = arith.addf %115, %119 : vector<2x16x16xf32>
      %c21 = arith.constant 21 : index
      %121 = memref.load %arg2[%c21] : memref<27xf32, #tpu.memory_space<smem>>
      %c0_80 = arith.constant 0 : index
      %c3_81 = arith.constant 3 : index
      %c0_82 = arith.constant 0 : index
      %122 = vector.load %arg6[%c0_80, %c3_81, %c0_82] : memref<2x22x22xf32, #tpu.memory_space<vmem>>, vector<2x16x16xf32>
      %123 = vector.broadcast %121 : f32 to vector<2x16x16xf32>
      %124 = arith.mulf %123, %122 : vector<2x16x16xf32>
      %c22 = arith.constant 22 : index
      %125 = memref.load %arg2[%c22] : memref<27xf32, #tpu.memory_space<smem>>
      %c0_83 = arith.constant 0 : index
      %c3_84 = arith.constant 3 : index
      %c3_85 = arith.constant 3 : index
      %126 = vector.load %arg6[%c0_83, %c3_84, %c3_85] : memref<2x22x22xf32, #tpu.memory_space<vmem>>, vector<2x16x16xf32>
      %127 = vector.broadcast %125 : f32 to vector<2x16x16xf32>
      %128 = arith.mulf %127, %126 : vector<2x16x16xf32>
      %129 = arith.addf %124, %128 : vector<2x16x16xf32>
      %c23 = arith.constant 23 : index
      %130 = memref.load %arg2[%c23] : memref<27xf32, #tpu.memory_space<smem>>
      %c0_86 = arith.constant 0 : index
      %c3_87 = arith.constant 3 : index
      %c6_88 = arith.constant 6 : index
      %131 = vector.load %arg6[%c0_86, %c3_87, %c6_88] : memref<2x22x22xf32, #tpu.memory_space<vmem>>, vector<2x16x16xf32>
      %132 = vector.broadcast %130 : f32 to vector<2x16x16xf32>
      %133 = arith.mulf %132, %131 : vector<2x16x16xf32>
      %134 = arith.addf %129, %133 : vector<2x16x16xf32>
      %c24 = arith.constant 24 : index
      %135 = memref.load %arg2[%c24] : memref<27xf32, #tpu.memory_space<smem>>
      %c0_89 = arith.constant 0 : index
      %c6_90 = arith.constant 6 : index
      %c0_91 = arith.constant 0 : index
      %136 = vector.load %arg6[%c0_89, %c6_90, %c0_91] : memref<2x22x22xf32, #tpu.memory_space<vmem>>, vector<2x16x16xf32>
      %137 = vector.broadcast %135 : f32 to vector<2x16x16xf32>
      %138 = arith.mulf %137, %136 : vector<2x16x16xf32>
      %c25 = arith.constant 25 : index
      %139 = memref.load %arg2[%c25] : memref<27xf32, #tpu.memory_space<smem>>
      %c0_92 = arith.constant 0 : index
      %c6_93 = arith.constant 6 : index
      %c3_94 = arith.constant 3 : index
      %140 = vector.load %arg6[%c0_92, %c6_93, %c3_94] : memref<2x22x22xf32, #tpu.memory_space<vmem>>, vector<2x16x16xf32>
      %141 = vector.broadcast %139 : f32 to vector<2x16x16xf32>
      %142 = arith.mulf %141, %140 : vector<2x16x16xf32>
      %143 = arith.addf %138, %142 : vector<2x16x16xf32>
      %c26 = arith.constant 26 : index
      %144 = memref.load %arg2[%c26] : memref<27xf32, #tpu.memory_space<smem>>
      %c0_95 = arith.constant 0 : index
      %c6_96 = arith.constant 6 : index
      %c6_97 = arith.constant 6 : index
      %145 = vector.load %arg6[%c0_95, %c6_96, %c6_97] : memref<2x22x22xf32, #tpu.memory_space<vmem>>, vector<2x16x16xf32>
      %146 = vector.broadcast %144 : f32 to vector<2x16x16xf32>
      %147 = arith.mulf %146, %145 : vector<2x16x16xf32>
      %148 = arith.addf %143, %147 : vector<2x16x16xf32>
      %149 = arith.addf %120, %134 : vector<2x16x16xf32>
      %c2_98 = arith.constant 2 : index
      %150 = memref.load %arg3[%c2_98] : memref<3xf32, #tpu.memory_space<smem>>
      %151 = vector.broadcast %150 : f32 to vector<2x16x16xf32>
      %152 = arith.addf %148, %151 : vector<2x16x16xf32>
      %153 = arith.addf %149, %152 : vector<2x16x16xf32>
      %154 = arith.negf %153 : vector<2x16x16xf32>
      %155 = math.exp %154 : vector<2x16x16xf32>
      %cst_99 = arith.constant 1.000000e+00 : f32
      %156 = vector.broadcast %cst_99 : f32 to vector<2x16x16xf32>
      %157 = arith.addf %156, %155 : vector<2x16x16xf32>
      %158 = arith.divf %156, %157 : vector<2x16x16xf32>
      %c0_100 = arith.constant 0 : index
      %c0_101 = arith.constant 0 : index
      %c0_102 = arith.constant 0 : index
      %c0_103 = arith.constant 0 : index
      %159 = vector.load %arg5[%c0_100, %c0_101, %c0_102, %c0_103] : memref<2x1x16x16xf32, #tpu.memory_space<vmem>>, vector<2x1x16x16xf32>
      %160 = vector.shape_cast %159 : vector<2x1x16x16xf32> to vector<2x16x16xf32>
      %161 = vector.shape_cast %158 : vector<2x16x16xf32> to vector<2x1x16x16xf32>
      tpu.vector_store %arg5[%c0_100, %c0_101, %c0_102, %c0_103], %161 {strides = array<i32>} : memref<2x1x16x16xf32, #tpu.memory_space<vmem>>, vector<2x1x16x16xf32>,
    } else {
    }
    return
  }
  func.func @transform_0(%arg0: i32, %arg1: i32) -> i32 {
    %c0_i32 = arith.constant 0 : i32
    %c0_i32_0 = arith.constant 0 : i32
    return %c0_i32 : i32
  }
  func.func @transform_1(%arg0: i32, %arg1: i32) -> i32 {
    %c0_i32 = arith.constant 0 : i32
    %c0_i32_0 = arith.constant 0 : i32
    return %c0_i32 : i32
  }
  func.func @transform_2(%arg0: i32, %arg1: i32) -> (i32, i32, i32, i32) {
    %c0_i32 = arith.constant 0 : i32
    %c0_i32_0 = arith.constant 0 : i32
    %c0_i32_1 = arith.constant 0 : i32
    return %arg0, %arg1, %c0_i32, %c0_i32_0 : i32, i32, i32, i32
  }
  func.func @transform_3(%arg0: i32, %arg1: i32) -> (i32, i32, i32, i32) {
    %c0_i32 = arith.constant 0 : i32
    %c0_i32_0 = arith.constant 0 : i32
    %c0_i32_1 = arith.constant 0 : i32
    %c0_i32_2 = arith.constant 0 : i32
    return %arg0, %c0_i32, %c0_i32_0, %c0_i32_1 : i32, i32, i32, i32
  }
}

</mosaic_0001>

<bundles_post_ra>
// kernel: tpu_custom_call.1
= control target key start
LH: loop header
LB: loop body
LE: loop exit
PB: predicated region body
PF: predicated region fallthrough
CT: control target
= control target key end

     0   :  { %8 = vsyncpa [#allocation6], 0  ;;  %s1335_s0 = inlined_call_operand.hbm [shape: f32[27], index: 0, kind: input, shape index: {}]   ;;  %s1336_s1 = inlined_call_operand.vmem [shape: f32[3], index: 1, kind: input, shape index: {}]   ;;  %s1337_s2 = inlined_call_operand.hbm [shape: f32[2,4,16,16], index: 2, kind: input, shape index: {}]   ;;  %s1338_s3 = inlined_call_operand.hbm [shape: f32[2,1,16,16], index: 3, kind: output, shape index: {}]  }
   0x1   :  { %9 = vsyncpa [#allocation7], 0 }
   0x2   :  { %10 = vsyncpa [#allocation4], 0 }
   0x3   :  { %11 = vsyncpa [#allocation5], 0  ;;  %s26_s14 = sshll.u32 %s1336_s1, 4  ;;  %s917_s17 = scalar_lea.hbm %s1335_s0, 16  ;;  %s27_s14 = int_to_ptr.vmem [resolvable:$true] %s26_s14 }
   0x4   :  { %p918_p0 = scmp.ne.s32.totalorder %s1335_s0, %s917_s17  ;;  %p921_p1 = scmp.lt.u32.totalorder %s917_s17, %s1335_s0 }
   0x6   :  { %p923_p2 = pnand %p921_p1, %p918_p0 }
   0x8   :  { %926 = shalt.err (!%p923_p2)
}
   0x9   :  { %s991_s22 = smov [#allocation3]   ;;  %s927_s1 = scalar_lea.vmem %s27_s14, 16 }
   0xa   :  { %19 = dma.hbm_to_smem %s1335_s0, 16, %s991_s22, [#allocation6]  }
   0xb   :  { %p928_p3 = scmp.ne.s32.totalorder %s27_s14, %s927_s1  ;;  %p932_p4 = scmp.lt.s32.totalorder %s27_s14, %s27_s14 }
   0xc   :  { %p933_p5 = scmp.lt.s32.totalorder %s927_s1, %s927_s1 }
   0xe   :  { %p934_p6 = por %p933_p5, %p932_p4 }
  0x10   :  { %p935_p7 = pnand %p934_p6, %p928_p3 }
  0x12   :  { %938 = shalt.err (!%p935_p7)
}
  0x13   :  { %s992_s25 = smov [#allocation8]   ;;  %s993_s26 = smov [#allocation9]  }
  0x14   :  { %29 = dma.vmem_to_smem %s27_s14, 16, %s992_s25, [#allocation7]  }
  0x15   :  { %s35_s27 = sshll.u32 %s993_s26, 4  ;;  %s939_s30 = scalar_lea.hbm %s1337_s2, 2048  ;;  %s36_s27 = int_to_ptr.vmem [resolvable:$true] %s35_s27 }
  0x16   :  { %p940_p8 = scmp.ne.s32.totalorder %s1337_s2, %s939_s30  ;;  %p943_p9 = scmp.lt.u32.totalorder %s939_s30, %s1337_s2 }
  0x18   :  { %p945_p10 = pnand %p943_p9, %p940_p8 }
  0x1a   :  { %948 = shalt.err (!%p945_p10)
}
  0x1b   :  { %s949_s7 = scalar_lea.vmem %s36_s27, 2048  ;;  %p954_p12 = scmp.lt.s32.totalorder %s36_s27, %s36_s27 }
  0x1c   :  { %p950_p11 = scmp.ne.s32.totalorder %s36_s27, %s949_s7  ;;  %p955_p13 = scmp.lt.s32.totalorder %s949_s7, %s949_s7 }
  0x1e   :  { %p956_p0 = por %p955_p13, %p954_p12 }
  0x20   :  { %p957_p1 = pnand %p956_p0, %p950_p11 }
  0x22   :  { %960 = shalt.err (!%p957_p1)
}
  0x23   :  { %s994_s8 = smov 128   ;;  %s995_s9 = smov 8  }
  0x24   :  { %41 = dma.hbm_to_vmem [thread:$0]  %s1337_s2, 2048, %s36_s27, [#allocation4], %s994_s8, %s994_s8, %s995_s9  }
  0x25   :  { %983 = dma.done.wait [#allocation6], 16  }
  0x26   :  { %984 = vsyncadd [#allocation6], 4294967280 }
  0x27   :  { %985 = dma.done.wait [#allocation7], 16  }
  0x28   :  { %986 = vsyncadd [#allocation7], 4294967280 }
  0x29   :  { %987 = dma.done.wait [#allocation4], 2048  }
  0x2a   :  { %988 = vsyncadd [#allocation4], 4294965248 }
  0x2b   :  { %51 = sfence }
  0x2c   :  { %v60_v0 = vld [vmem:[#allocation9 + $0x40] sm:$0xff]  ;;  %v62_v1 = vld [vmem:[#allocation9 + $0x50] sm:$0xff]  ;;  %vm68_vm0 = vcmask 130048   ;;  %v61_v14 = vld [vmem:[#allocation9 + $0x48] sm:$0xff]  ;;  %vm101_vm1 = vcmask 179200   ;;  %s996_s2 = smov 3  }
  0x2d   :  { %v64_v2 = vld [vmem:[#allocation9 + $0x60] sm:$0xff]  ;;  %v66_v3 = vld [vmem:[#allocation9 + $0x70] sm:$0xff]  ;;  %v83_v4 = vsel %vm68_vm0, %v60_v0, -inf  ;;  %v84_v5 = vsel %vm68_vm0, %v62_v1, -inf  ;;  %v63_v18 = vld [vmem:[#allocation9 + $0x58] sm:$0xff]  ;;  %v90_v21 = vsel %vm68_vm0, %v61_v14, -inf }
  0x2e   :  { %v86_v6 = vsel %vm68_vm0, %v64_v2, -inf  ;;  %v52_v7 = vld [vmem:[#allocation9] sm:$0xff]  ;;  %v54_v8 = vld [vmem:[#allocation9 + $0x10] sm:$0xff]  ;;  %v85_v9 = vmax.f32 %v83_v4, %v84_v5  ;;  %v88_v15 = vsel %vm68_vm0, %v66_v3, -inf  ;;  %v65_v19 = vld [vmem:[#allocation9 + $0x68] sm:$0xff]  ;;  %v91_v24 = vsel %vm68_vm0, %v63_v18, -inf }
  0x2f   :  { %v56_v10 = vld [vmem:[#allocation9 + $0x20] sm:$0xff]  ;;  %v58_v11 = vld [vmem:[#allocation9 + $0x30] sm:$0xff]  ;;  %v69_v12 = vsel %vm68_vm0, %v52_v7, -inf  ;;  %v70_v13 = vsel %vm68_vm0, %v54_v8, -inf  ;;  %v67_v20 = vld [vmem:[#allocation9 + $0x78] sm:$0xff]  ;;  %v93_v25 = vsel %vm68_vm0, %v65_v19, -inf  ;;  %v92_v30 = vmax.f32 %v90_v21, %v91_v24 }
  0x30   :  { %v71_v16 = vmax.f32 %v69_v12, %v70_v13  ;;  %v72_v17 = vsel %vm68_vm0, %v56_v10, -inf  ;;  %v87_v22 = vmax.f32 %v85_v9, %v86_v6  ;;  %v74_v23 = vsel %vm68_vm0, %v58_v11, -inf  ;;  %v53_v26 = vld [vmem:[#allocation9 + $0x8] sm:$0xff]  ;;  %v55_v27 = vld [vmem:[#allocation9 + $0x18] sm:$0xff]  ;;  %s854_s12 = sld [smem:[#allocation3 + $0x1]]  ;;  %s857_s13 = sld [smem:[#allocation3 + $0x4]] }
  0x31   :  { %v57_v28 = vld [vmem:[#allocation9 + $0x28] sm:$0xff]  ;;  %v59_v31 = vld [vmem:[#allocation9 + $0x38] sm:$0xff]  ;;  %v76_v32 = vsel %vm68_vm0, %v53_v26, -inf  ;;  %v77_v33 = vsel %vm68_vm0, %v55_v27, -inf  ;;  %v95_v35 = vsel %vm68_vm0, %v67_v20, -inf  ;;  %v94_v39 = vmax.f32 %v92_v30, %v93_v25  ;;  %s998_s14 = smov 127  }
  0x32   :  { %v73_v29 = vmax.f32 %v71_v16, %v72_v17  ;;  %v89_v34 = vmax.f32 %v87_v22, %v88_v15  ;;  %v78_v36 = vmax.f32 %v76_v32, %v77_v33  ;;  %v79_v37 = vsel %vm68_vm0, %v57_v28, -inf  ;;  %s860_s15 = sld [smem:[#allocation3 + $0x7]]  ;;  %s855_s16 = sld [smem:[#allocation3 + $0x2]] }
  0x33   :  { %v81_v40 = vsel %vm68_vm0, %v59_v31, -inf  ;;  %v997_v42 = vmov 0.0   ;;  %vm104_vm2 = vcmask 177152   ;;  %v96_v43 = vmax.f32 %v94_v39, %v95_v35  ;;  %s858_s17 = sld [smem:[#allocation3 + $0x5]]  ;;  %s999_s18 = smov 126  }
  0x34   :  { %v75_v38 = vmax.f32 %v73_v29, %v74_v23  ;;  %117 = vrot.lane.b32.xlu1 %v89_v34, %s996_s2  ;;  %v80_v41 = vmax.f32 %v78_v36, %v79_v37  ;;  %106 = vst.msk [vmem:[#allocation2 + $0x18] sm:$0xff] %vm101_vm1, %v997_v42  ;;  %107 = vst.msk [vmem:[#allocation2 + $0x20] sm:$0xff] %vm101_vm1, %v997_v42  ;;  %vm125_vm3 = vcmask 154648   ;;  %s861_s19 = sld [smem:[#allocation3 + $0x8]]  ;;  %s856_s20 = sld [smem:[#allocation3 + $0x3]] }
  0x35   :  { %102 = vst.msk [vmem:[#allocation2] sm:$0xff] %vm101_vm1, %v997_v42  ;;  %103 = vst.msk [vmem:[#allocation2 + $0x8] sm:$0xff] %vm101_vm1, %v997_v42  ;;  %s166_s21 = sld [smem:[#allocation3]]  ;;  %s859_s22 = sld [smem:[#allocation3 + $0x6]] }
  0x36   :  { %113 = vrot.lane.b32.xlu0 %v75_v38, %s996_s2  ;;  %108 = vst.msk [vmem:[#allocation2 + $0x28] sm:$0x3f] %vm104_vm2, %v997_v42  ;;  %105 = vst.msk [vmem:[#allocation2 + $0x10] sm:$0x3f] %vm104_vm2, %v997_v42  ;;  %v82_v44 = vmax.f32 %v80_v41, %v81_v40  ;;  %v177_v49 = vstv %s854_s12  ;;  %v239_v57 = vstv %s857_s13  ;;  %s356_s23 = sld [smem:[#allocation8]]  ;;  %s1000_s24 = smov 1  }
  0x37   :  { %s863_s1 = sld [smem:[#allocation3 + $0xa]]  ;;  %s866_s25 = sld [smem:[#allocation3 + $0xd]] }
  0x38   :  { %119 = vrot.lane.b32.xlu1 %v96_v43, %s996_s2  ;;  %v301_v2 = vstv %s860_s15  ;;  %v203_v10 = vstv %s855_s16  ;;  %s869_s26 = sld [smem:[#allocation3 + $0x10]]  ;;  %s864_s27 = sld [smem:[#allocation3 + $0xb]] }
  0x39   :  { %v265_v16 = vstv %s858_s17  ;;  %s867_s28 = sld [smem:[#allocation3 + $0xe]]  ;;  %s1001_s29 = smov 124  }
  0x3a   :  { %115 = vrot.lane.b32.xlu0 %v82_v44, %s996_s2  ;;  %v327_v21 = vstv %s861_s19  ;;  %v233_v42 = vstv %s856_s20  ;;  %s870_s30 = sld [smem:[#allocation3 + $0x11]]  ;;  %s865_s4 = sld [smem:[#allocation3 + $0xc]] }
  0x3b   :  { %s862_s5 = sld [smem:[#allocation3 + $0x9]]  ;;  %s868_s0 = sld [smem:[#allocation3 + $0xf]] }
  0x3c   :  { %s871_s6 = sld [smem:[#allocation8 + $0x1]]  ;;  %s1002_s7 = smov 2  }
  0x3d   :  { %s873_s10 = sld [smem:[#allocation3 + $0x13]]  ;;  %s876_s11 = sld [smem:[#allocation3 + $0x16]] }
  0x3e   :  { %s1003_s2 = smov 125   ;;  %s879_s12 = sld [smem:[#allocation3 + $0x19]] }
  0x3f   :  { %s874_s13 = sld [smem:[#allocation3 + $0x14]]  ;;  %s1004_s15 = smov 122  }
  0x40   :  { %s880_s16 = sld [smem:[#allocation3 + $0x1a]]  ;;  %s878_s19 = sld [smem:[#allocation3 + $0x18]] }
  0x41   :  { %s872_s17 = sld [smem:[#allocation3 + $0x12]] }
  0x42   :  { %s881_s20 = sld [smem:[#allocation8 + $0x2]] }
  0xa6   :  { %v118_v45 = vpop.permute.xlu1 %117 }
  0xa7   :  { %128 = vst.msk [vmem:[#allocation2 + $0x1b] sm:$0xff] %vm125_vm3, %v118_v45  ;;  %v171_v45 = vstv %s166_s21  ;;  %s1005_s21 = smov [#allocation10]  }
  0xa8   :  { %v114_v46 = vpop.permute.xlu0 %113 }
  0xa9   :  { %126 = vst.msk [vmem:[#allocation2 + $0x3] sm:$0xff] %vm125_vm3, %v114_v46  ;;  %v295_v46 = vstv %s859_s22  ;;  %s840_s22 = sshll.u32 %s1005_s21, 4  ;;  %s841_s22 = int_to_ptr.vmem [resolvable:$true] %s840_s22 }
  0xaa   :  { %v120_v47 = vpop.permute.xlu1 %119  ;;  %p966_p3 = scmp.lt.s32.totalorder %s841_s22, %s841_s22 }
  0xab   :  { %129 = vst.msk [vmem:[#allocation2 + $0x23] sm:$0xff] %vm125_vm3, %v120_v47 }
  0xac   :  { %v116_v48 = vpop.permute.xlu0 %115 }
  0xad   :  { %127 = vst.msk [vmem:[#allocation2 + $0xb] sm:$0xff] %vm125_vm3, %v116_v48 }
  0xae   :  { %v1082_v51 = vld [vmem:[#allocation2 + $0x1a] sm:$0xff] }
  0xaf   :  { %v180_v53 = vmul.f32 %v177_v49, %v1082_v51  ;;  %v1098_v61 = vld [vmem:[#allocation2 + $0x1b] sm:$0xff]  ;;  %v206_v14 = vmul.f32 %v203_v10, %v1082_v51 }
  0xb0   :  { %v1080_v50 = vld [vmem:[#allocation2 + $0x2] sm:$0xff]  ;;  %v242_v63 = vmul.f32 %v239_v57, %v1098_v61  ;;  %v268_v19 = vmul.f32 %v265_v16, %v1098_v61 }
  0xb1   :  { %v178_v52 = vmul.f32 %v177_v49, %v1080_v50  ;;  %v1090_v56 = vld [vmem:[#allocation2 + $0x3] sm:$0xff]  ;;  %v204_v12 = vmul.f32 %v203_v10, %v1080_v50 }
  0xb2   :  { %v1092_v58 = vld [vmem:[#allocation2 + $0x22] sm:$0xff]  ;;  %v240_v59 = vmul.f32 %v239_v57, %v1090_v56  ;;  %v266_v17 = vmul.f32 %v265_v16, %v1090_v56  ;;  %v234_v47 = vmul.f32 %v233_v42, %v1090_v56 }
  0xb3   :  { %186 = vrot.lane.b32.xlu0 %v178_v52, %s998_s14  ;;  %v181_v60 = vmul.f32 %v177_v49, %v1092_v58  ;;  %v1108_v3 = vld [vmem:[#allocation2 + $0x23] sm:$0xff]  ;;  %v207_v18 = vmul.f32 %v203_v10, %v1092_v58  ;;  %v172_v52 = vmul.f32 %v171_v45, %v1080_v50 }
  0xb4   :  { %v1087_v54 = vld [vmem:[#allocation2 + $0xa] sm:$0xff]  ;;  %v243_v5 = vmul.f32 %v239_v57, %v1108_v3  ;;  %v1114_v6 = vld [vmem:[#allocation2 + $0x1c] sm:$0xff]  ;;  %v269_v23 = vmul.f32 %v265_v16, %v1108_v3  ;;  %v237_v56 = vmul.f32 %v233_v42, %v1108_v3  ;;  %v175_v3 = vmul.f32 %v171_v45, %v1092_v58 }
  0xb5   :  { %v179_v55 = vmul.f32 %v177_v49, %v1087_v54  ;;  %v1100_v62 = vld [vmem:[#allocation2 + $0xb] sm:$0xff]  ;;  %v304_v8 = vmul.f32 %v301_v2, %v1114_v6  ;;  %v205_v15 = vmul.f32 %v203_v10, %v1087_v54  ;;  %v330_v24 = vmul.f32 %v327_v21, %v1114_v6 }
  0xb6   :  { %v241_v0 = vmul.f32 %v239_v57, %v1100_v62  ;;  %v1106_v1 = vld [vmem:[#allocation2 + $0x4] sm:$0xff]  ;;  %v1116_v7 = vld [vmem:[#allocation2 + $0xc] sm:$0xff]  ;;  %v267_v20 = vmul.f32 %v265_v16, %v1100_v62  ;;  %v174_v57 = vmul.f32 %v171_v45, %v1082_v51  ;;  %v298_v51 = vmul.f32 %v295_v46, %v1114_v6 }
  0xb7   :  { %190 = vrot.lane.b32.xlu0 %v180_v53, %s998_s14  ;;  %188 = vrot.lane.b32.xlu1 %v179_v55, %s998_s14  ;;  %v302_v4 = vmul.f32 %v301_v2, %v1106_v1  ;;  %v303_v9 = vmul.f32 %v301_v2, %v1116_v7  ;;  %v1122_v11 = vld [vmem:[#allocation2 + $0x24] sm:$0xff]  ;;  %v328_v22 = vmul.f32 %v327_v21, %v1106_v1 }
  0xb8   :  { %v305_v13 = vmul.f32 %v301_v2, %v1122_v11  ;;  %v329_v25 = vmul.f32 %v327_v21, %v1116_v7  ;;  %v331_v26 = vmul.f32 %v327_v21, %v1122_v11  ;;  %v296_v55 = vmul.f32 %v295_v46, %v1106_v1 }
  0xbb   :  { %248 = vrot.lane.b32.xlu0 %v240_v59, %s998_s14  ;;  %192 = vrot.lane.b32.xlu1 %v181_v60, %s998_s14  ;;  %v235_v59 = vmul.f32 %v233_v42, %v1100_v62  ;;  %v236_v60 = vmul.f32 %v233_v42, %v1098_v61  ;;  %v398_v42 = vstv %s863_s1 }
  0xbf   :  { %252 = vrot.lane.b32.xlu0 %v242_v63, %s998_s14  ;;  %250 = vrot.lane.b32.xlu1 %v241_v0, %s998_s14  ;;  %v173_v0 = vmul.f32 %v171_v45, %v1087_v54 }
  0xc3   :  { %310 = vrot.lane.b32.xlu0 %v302_v4, %s998_s14  ;;  %254 = vrot.lane.b32.xlu1 %v243_v5, %s998_s14 }
  0xc7   :  { %314 = vrot.lane.b32.xlu0 %v304_v8, %s998_s14  ;;  %312 = vrot.lane.b32.xlu1 %v303_v9, %s998_s14  ;;  %v297_v8 = vmul.f32 %v295_v46, %v1116_v7  ;;  %v357_v9 = vstv %s356_s23  ;;  %v299_v7 = vmul.f32 %v295_v46, %v1122_v11  ;;  %s961_s23 = scalar_lea.vmem %s841_s22, 512 }
  0xc8   :  { %p962_p2 = scmp.ne.s32.totalorder %s841_s22, %s961_s23  ;;  %p967_p4 = scmp.lt.s32.totalorder %s961_s23, %s961_s23 }
  0xca   :  { %p968_p5 = por %p967_p4, %p966_p3 }
  0xcb   :  { %212 = vrot.lane.b32.xlu0 %v204_v12, %s999_s18  ;;  %316 = vrot.lane.b32.xlu1 %v305_v13, %s998_s14  ;;  %s877_s14 = sld [smem:[#allocation3 + $0x17]] }
  0xcc   :  { %p969_p6 = pnand %p968_p5, %p962_p2 }
  0xcf   :  { %216 = vrot.lane.b32.xlu0 %v206_v14, %s999_s18  ;;  %214 = vrot.lane.b32.xlu1 %v205_v15, %s999_s18 }
  0xd3   :  { %274 = vrot.lane.b32.xlu0 %v266_v17, %s999_s18  ;;  %218 = vrot.lane.b32.xlu1 %v207_v18, %s999_s18 }
  0xd7   :  { %278 = vrot.lane.b32.xlu0 %v268_v19, %s999_s18  ;;  %276 = vrot.lane.b32.xlu1 %v267_v20, %s999_s18 }
  0xdb   :  { %336 = vrot.lane.b32.xlu0 %v328_v22, %s999_s18  ;;  %280 = vrot.lane.b32.xlu1 %v269_v23, %s999_s18 }
  0xdf   :  { %340 = vrot.lane.b32.xlu0 %v330_v24, %s999_s18  ;;  %338 = vrot.lane.b32.xlu1 %v329_v25, %s999_s18 }
  0xe3   :  { %342 = vrot.lane.b32.xlu1 %v331_v26, %s999_s18 }
 0x125   :  { %v187_v27 = vpop.permute.xlu0 %186 }
 0x126   :  { %v198_v63 = vadd.f32 %v187_v27, %v172_v52 }
 0x129   :  { %v189_v28 = vpop.permute.xlu1 %188  ;;  %v191_v29 = vpop.permute.xlu0 %190 }
 0x12a   :  { %v199_v13 = vadd.f32 %v189_v28, %v173_v0  ;;  %v200_v61 = vadd.f32 %v191_v29, %v174_v57 }
 0x12d   :  { %v193_v30 = vpop.permute.xlu1 %192  ;;  %v249_v31 = vpop.permute.xlu0 %248 }
 0x12e   :  { %v260_v53 = vadd.f32 %v249_v31, %v234_v47  ;;  %v201_v26 = vadd.f32 %v193_v30, %v175_v3 }
 0x131   :  { %v251_v32 = vpop.permute.xlu1 %250  ;;  %v253_v33 = vpop.permute.xlu0 %252 }
 0x132   :  { %v261_v5 = vadd.f32 %v251_v32, %v235_v59  ;;  %v262_v1 = vadd.f32 %v253_v33, %v236_v60 }
 0x135   :  { %v255_v34 = vpop.permute.xlu1 %254  ;;  %v311_v35 = vpop.permute.xlu0 %310 }
 0x136   :  { %v322_v2 = vadd.f32 %v311_v35, %v296_v55  ;;  %v263_v19 = vadd.f32 %v255_v34, %v237_v56  ;;  %v522_v56 = vstv %s869_s26 }
 0x139   :  { %v313_v36 = vpop.permute.xlu1 %312  ;;  %v315_v37 = vpop.permute.xlu0 %314 }
 0x13a   :  { %v323_v14 = vadd.f32 %v313_v36, %v297_v8  ;;  %v324_v54 = vadd.f32 %v315_v37, %v298_v51 }
 0x13d   :  { %v317_v38 = vpop.permute.xlu1 %316  ;;  %v213_v39 = vpop.permute.xlu0 %212 }
 0x13e   :  { %v224_v12 = vadd.f32 %v213_v39, %v198_v63  ;;  %v325_v27 = vadd.f32 %v317_v38, %v299_v7 }
 0x141   :  { %v215_v40 = vpop.permute.xlu1 %214  ;;  %v217_v41 = vpop.permute.xlu0 %216 }
 0x142   :  { %v225_v20 = vadd.f32 %v215_v40, %v199_v13  ;;  %v226_v23 = vadd.f32 %v217_v41, %v200_v61 }
 0x145   :  { %v219_v43 = vpop.permute.xlu1 %218  ;;  %v275_v44 = vpop.permute.xlu0 %274 }
 0x146   :  { %v286_v4 = vadd.f32 %v275_v44, %v260_v53  ;;  %v227_v34 = vadd.f32 %v219_v43, %v201_v26  ;;  %v460_v53 = vstv %s866_s25 }
 0x148   :  { %v352_v16 = vadd.f32 %v286_v4, %v224_v12 }
 0x149   :  { %v277_v48 = vpop.permute.xlu1 %276  ;;  %v279_v49 = vpop.permute.xlu0 %278 }
 0x14a   :  { %v287_v15 = vadd.f32 %v277_v48, %v261_v5  ;;  %v288_v17 = vadd.f32 %v279_v49, %v262_v1 }
 0x14c   :  { %v353_v28 = vadd.f32 %v287_v15, %v225_v20  ;;  %v354_v29 = vadd.f32 %v288_v17, %v226_v23 }
 0x14d   :  { %v281_v50 = vpop.permute.xlu1 %280  ;;  %v337_v10 = vpop.permute.xlu0 %336 }
 0x14e   :  { %v348_v62 = vadd.f32 %v337_v10, %v322_v2  ;;  %v289_v31 = vadd.f32 %v281_v50, %v263_v19  ;;  %v548_v19 = vstv %s870_s30 }
 0x150   :  { %v358_v18 = vadd.f32 %v357_v9, %v348_v62  ;;  %v355_v37 = vadd.f32 %v289_v31, %v227_v34  ;;  %v424_v62 = vstv %s864_s27 }
 0x151   :  { %v339_v21 = vpop.permute.xlu1 %338  ;;  %v341_v22 = vpop.permute.xlu0 %340 }
 0x152   :  { %v349_v6 = vadd.f32 %v339_v21, %v323_v14  ;;  %v350_v24 = vadd.f32 %v341_v22, %v324_v54  ;;  %v362_v25 = vadd.f32 %v358_v18, %v352_v16  ;;  %v486_v54 = vstv %s867_s28 }
 0x154   :  { %v359_v32 = vadd.f32 %v357_v9, %v349_v6  ;;  %v360_v33 = vadd.f32 %v357_v9, %v350_v24  ;;  %370 = vrot.lane.b32.xlu0 %v362_v25, %s1000_s24 }
 0x155   :  { %v343_v58 = vpop.permute.xlu1 %342 }
 0x156   :  { %v351_v35 = vadd.f32 %v343_v58, %v325_v27  ;;  %v363_v11 = vadd.f32 %v359_v32, %v353_v28  ;;  %v364_v36 = vadd.f32 %v360_v33, %v354_v29 }
 0x158   :  { %v361_v39 = vadd.f32 %v357_v9, %v351_v35  ;;  %372 = vrot.lane.b32.xlu1 %v363_v11, %s1000_s24  ;;  %374 = vrot.lane.b32.xlu0 %v364_v36, %s1000_s24 }
 0x15a   :  { %v365_v40 = vadd.f32 %v361_v39, %v355_v37  ;;  %v454_v37 = vstv %s865_s4 }
 0x15c   :  { %376 = vrot.lane.b32.xlu1 %v365_v40, %s1000_s24 }
 0x1c6   :  { %v371_v30 = vpop.permute.xlu0 %370 }
 0x1c7   :  { %383 = vst.msk [vmem:[#allocation2 + $0x3] sm:$0xff] %vm125_vm3, %v371_v30  ;;  %v392_v30 = vstv %s862_s5 }
 0x1ca   :  { %v373_v38 = vpop.permute.xlu1 %372  ;;  %v375_v41 = vpop.permute.xlu0 %374 }
 0x1cb   :  { %384 = vst.msk [vmem:[#allocation2 + $0xb] sm:$0xff] %vm125_vm3, %v373_v38  ;;  %385 = vst.msk [vmem:[#allocation2 + $0x1b] sm:$0xff] %vm125_vm3, %v375_v41  ;;  %v516_v38 = vstv %s868_s0 }
 0x1ce   :  { %v377_v43 = vpop.permute.xlu1 %376  ;;  %v1167_v44 = vld [vmem:[#allocation2 + $0x1] sm:$0xff] }
 0x1cf   :  { %386 = vst.msk [vmem:[#allocation2 + $0x23] sm:$0xff] %vm125_vm3, %v377_v43  ;;  %v399_v45 = vmul.f32 %v398_v42, %v1167_v44  ;;  %v1178_v52 = vld [vmem:[#allocation2 + $0x3] sm:$0xff]  ;;  %v425_v61 = vmul.f32 %v424_v62, %v1167_v44 }
 0x1d0   :  { %v461_v59 = vmul.f32 %v460_v53, %v1178_v52  ;;  %v487_v17 = vmul.f32 %v486_v54, %v1178_v52  ;;  %v455_v41 = vmul.f32 %v454_v37, %v1178_v52 }
 0x1d1   :  { %407 = vrot.lane.b32.xlu0 %v399_v45, %s999_s18  ;;  %v393_v45 = vmul.f32 %v392_v30, %v1167_v44 }
 0x1d2   :  { %v1172_v46 = vld [vmem:[#allocation2 + $0x9] sm:$0xff]  ;;  %v1174_v47 = vld [vmem:[#allocation2 + $0x19] sm:$0xff] }
 0x1d3   :  { %v400_v48 = vmul.f32 %v398_v42, %v1172_v46  ;;  %v401_v49 = vmul.f32 %v398_v42, %v1174_v47  ;;  %v1186_v60 = vld [vmem:[#allocation2 + $0xb] sm:$0xff]  ;;  %v1188_v63 = vld [vmem:[#allocation2 + $0x1b] sm:$0xff]  ;;  %v426_v14 = vmul.f32 %v424_v62, %v1172_v46  ;;  %v427_v15 = vmul.f32 %v424_v62, %v1174_v47 }
 0x1d4   :  { %v462_v0 = vmul.f32 %v460_v53, %v1186_v60  ;;  %v463_v2 = vmul.f32 %v460_v53, %v1188_v63  ;;  %v1196_v5 = vld [vmem:[#allocation2 + $0x5] sm:$0xff]  ;;  %v1202_v9 = vld [vmem:[#allocation2 + $0xd] sm:$0xff]  ;;  %v488_v18 = vmul.f32 %v486_v54, %v1186_v60  ;;  %v489_v3 = vmul.f32 %v486_v54, %v1188_v63 }
 0x1d5   :  { %409 = vrot.lane.b32.xlu1 %v400_v48, %s999_s18  ;;  %411 = vrot.lane.b32.xlu0 %v401_v49, %s999_s18  ;;  %v523_v50 = vmul.f32 %v522_v56, %v1196_v5  ;;  %v524_v1 = vmul.f32 %v522_v56, %v1202_v9  ;;  %v549_v20 = vmul.f32 %v548_v19, %v1196_v5 }
 0x1d6   :  { %v1182_v55 = vld [vmem:[#allocation2 + $0x21] sm:$0xff]  ;;  %v550_v21 = vmul.f32 %v548_v19, %v1202_v9  ;;  %v517_v49 = vmul.f32 %v516_v38, %v1196_v5 }
 0x1d7   :  { %v402_v57 = vmul.f32 %v398_v42, %v1182_v55  ;;  %v1194_v4 = vld [vmem:[#allocation2 + $0x23] sm:$0xff]  ;;  %v428_v16 = vmul.f32 %v424_v62, %v1182_v55 }
 0x1d8   :  { %v464_v8 = vmul.f32 %v460_v53, %v1194_v4  ;;  %v1204_v10 = vld [vmem:[#allocation2 + $0x1d] sm:$0xff]  ;;  %v1210_v12 = vld [vmem:[#allocation2 + $0x25] sm:$0xff]  ;;  %v490_v7 = vmul.f32 %v486_v54, %v1194_v4  ;;  %v394_v53 = vmul.f32 %v392_v30, %v1172_v46  ;;  %v458_v52 = vmul.f32 %v454_v37, %v1194_v4 }
 0x1d9   :  { %413 = vrot.lane.b32.xlu1 %v402_v57, %s999_s18  ;;  %469 = vrot.lane.b32.xlu0 %v461_v59, %s999_s18  ;;  %v525_v51 = vmul.f32 %v522_v56, %v1204_v10  ;;  %v526_v13 = vmul.f32 %v522_v56, %v1210_v12  ;;  %v551_v22 = vmul.f32 %v548_v19, %v1204_v10 }
 0x1da   :  { %v552_v23 = vmul.f32 %v548_v19, %v1210_v12  ;;  %v395_v57 = vmul.f32 %v392_v30, %v1174_v47  ;;  %v456_v59 = vmul.f32 %v454_v37, %v1186_v60  ;;  %v519_v46 = vmul.f32 %v516_v38, %v1204_v10 }
 0x1db   :  { %v396_v4 = vmul.f32 %v392_v30, %v1182_v55 }
 0x1dd   :  { %471 = vrot.lane.b32.xlu1 %v462_v0, %s999_s18  ;;  %473 = vrot.lane.b32.xlu0 %v463_v2, %s999_s18  ;;  %v457_v2 = vmul.f32 %v454_v37, %v1188_v63  ;;  %v618_v37 = vstv %s873_s10 }
 0x1e1   :  { %475 = vrot.lane.b32.xlu1 %v464_v8, %s999_s18  ;;  %531 = vrot.lane.b32.xlu0 %v523_v50, %s999_s18 }
 0x1e5   :  { %533 = vrot.lane.b32.xlu1 %v524_v1, %s999_s18  ;;  %535 = vrot.lane.b32.xlu0 %v525_v51, %s999_s18  ;;  %v518_v1 = vmul.f32 %v516_v38, %v1202_v9  ;;  %v578_v51 = vstv %s871_s6  ;;  %v520_v9 = vmul.f32 %v516_v38, %v1210_v12 }
 0x1e9   :  { %537 = vrot.lane.b32.xlu1 %v526_v13, %s999_s18  ;;  %433 = vrot.lane.b32.xlu0 %v425_v61, %s1001_s29  ;;  %s875_s18 = sld [smem:[#allocation3 + $0x15]] }
 0x1ed   :  { %435 = vrot.lane.b32.xlu1 %v426_v14, %s1001_s29  ;;  %437 = vrot.lane.b32.xlu0 %v427_v15, %s1001_s29 }
 0x1f1   :  { %439 = vrot.lane.b32.xlu1 %v428_v16, %s1001_s29  ;;  %495 = vrot.lane.b32.xlu0 %v487_v17, %s1001_s29 }
 0x1f5   :  { %497 = vrot.lane.b32.xlu1 %v488_v18, %s1001_s29  ;;  %499 = vrot.lane.b32.xlu0 %v489_v3, %s1001_s29 }
 0x1f9   :  { %501 = vrot.lane.b32.xlu1 %v490_v7, %s1001_s29  ;;  %557 = vrot.lane.b32.xlu0 %v549_v20, %s1001_s29 }
 0x1fd   :  { %559 = vrot.lane.b32.xlu1 %v550_v21, %s1001_s29  ;;  %561 = vrot.lane.b32.xlu0 %v551_v22, %s1001_s29 }
 0x201   :  { %563 = vrot.lane.b32.xlu1 %v552_v23, %s1001_s29 }
 0x243   :  { %v408_v6 = vpop.permute.xlu0 %407 }
 0x244   :  { %v419_v0 = vadd.f32 %v408_v6, %v393_v45 }
 0x247   :  { %v410_v24 = vpop.permute.xlu1 %409  ;;  %v412_v25 = vpop.permute.xlu0 %411 }
 0x248   :  { %v420_v61 = vadd.f32 %v410_v24, %v394_v53  ;;  %v421_v60 = vadd.f32 %v412_v25, %v395_v57 }
 0x24b   :  { %v414_v26 = vpop.permute.xlu1 %413  ;;  %v470_v27 = vpop.permute.xlu0 %469 }
 0x24c   :  { %v481_v48 = vadd.f32 %v470_v27, %v455_v41  ;;  %v422_v23 = vadd.f32 %v414_v26, %v396_v4 }
 0x24f   :  { %v472_v28 = vpop.permute.xlu1 %471  ;;  %v474_v29 = vpop.permute.xlu0 %473 }
 0x250   :  { %v482_v50 = vadd.f32 %v472_v28, %v456_v59  ;;  %v483_v5 = vadd.f32 %v474_v29, %v457_v2 }
 0x253   :  { %v476_v31 = vpop.permute.xlu1 %475  ;;  %v532_v32 = vpop.permute.xlu0 %531 }
 0x254   :  { %v543_v56 = vadd.f32 %v532_v32, %v517_v49  ;;  %v484_v18 = vadd.f32 %v476_v31, %v458_v52  ;;  %v742_v52 = vstv %s879_s12 }
 0x257   :  { %v534_v33 = vpop.permute.xlu1 %533  ;;  %v536_v58 = vpop.permute.xlu0 %535 }
 0x258   :  { %v544_v14 = vadd.f32 %v534_v33, %v518_v1  ;;  %v545_v63 = vadd.f32 %v536_v58, %v519_v46 }
 0x25b   :  { %v538_v34 = vpop.permute.xlu1 %537  ;;  %v434_v35 = vpop.permute.xlu0 %433 }
 0x25c   :  { %v445_v13 = vadd.f32 %v434_v35, %v419_v0  ;;  %v546_v6 = vadd.f32 %v538_v34, %v520_v9 }
 0x25f   :  { %v436_v11 = vpop.permute.xlu1 %435  ;;  %v438_v36 = vpop.permute.xlu0 %437 }
 0x260   :  { %v446_v3 = vadd.f32 %v436_v11, %v420_v61  ;;  %v447_v20 = vadd.f32 %v438_v36, %v421_v60 }
 0x263   :  { %v440_v39 = vpop.permute.xlu1 %439  ;;  %v496_v40 = vpop.permute.xlu0 %495 }
 0x264   :  { %v507_v8 = vadd.f32 %v496_v40, %v481_v48  ;;  %v448_v31 = vadd.f32 %v440_v39, %v422_v23  ;;  %v680_v48 = vstv %s876_s11 }
 0x266   :  { %v573_v54 = vadd.f32 %v507_v8, %v445_v13 }
 0x267   :  { %v498_v42 = vpop.permute.xlu1 %497  ;;  %v500_v43 = vpop.permute.xlu0 %499 }
 0x268   :  { %v508_v15 = vadd.f32 %v498_v42, %v482_v50  ;;  %v509_v16 = vadd.f32 %v500_v43, %v483_v5 }
 0x26a   :  { %v574_v24 = vadd.f32 %v508_v15, %v446_v3  ;;  %v575_v25 = vadd.f32 %v509_v16, %v447_v20 }
 0x26b   :  { %v502_v44 = vpop.permute.xlu1 %501  ;;  %v558_v62 = vpop.permute.xlu0 %557 }
 0x26c   :  { %v569_v47 = vadd.f32 %v558_v62, %v543_v56  ;;  %v510_v27 = vadd.f32 %v502_v44, %v484_v18  ;;  %v768_v18 = vstv %s880_s16 }
 0x26e   :  { %v579_v17 = vadd.f32 %v578_v51, %v569_v47  ;;  %v576_v58 = vadd.f32 %v510_v27, %v448_v31  ;;  %v644_v47 = vstv %s874_s13 }
 0x26f   :  { %v560_v19 = vpop.permute.xlu1 %559  ;;  %v562_v7 = vpop.permute.xlu0 %561 }
 0x270   :  { %v570_v10 = vadd.f32 %v560_v19, %v544_v14  ;;  %v571_v21 = vadd.f32 %v562_v7, %v545_v63  ;;  %v583_v22 = vadd.f32 %v579_v17, %v573_v54  ;;  %v706_v63 = vstv %s877_s14 }
 0x272   :  { %v580_v28 = vadd.f32 %v578_v51, %v570_v10  ;;  %v581_v29 = vadd.f32 %v578_v51, %v571_v21  ;;  %591 = vrot.lane.b32.xlu0 %v583_v22, %s1002_s7 }
 0x273   :  { %v564_v55 = vpop.permute.xlu1 %563 }
 0x274   :  { %v572_v32 = vadd.f32 %v564_v55, %v546_v6  ;;  %v584_v12 = vadd.f32 %v580_v28, %v574_v24  ;;  %v585_v33 = vadd.f32 %v581_v29, %v575_v25 }
 0x276   :  { %v582_v35 = vadd.f32 %v578_v51, %v572_v32  ;;  %593 = vrot.lane.b32.xlu1 %v584_v12, %s1002_s7  ;;  %595 = vrot.lane.b32.xlu0 %v585_v33, %s1002_s7  ;;  %v612_v12 = vstv %s872_s17  ;;  %v674_v33 = vstv %s875_s18 }
 0x278   :  { %v586_v11 = vadd.f32 %v582_v35, %v576_v58 }
 0x27a   :  { %597 = vrot.lane.b32.xlu1 %v586_v11, %s1002_s7 }
 0x2e4   :  { %v592_v26 = vpop.permute.xlu0 %591 }
 0x2e5   :  { %603 = vst.msk [vmem:[#allocation2 + $0x3] sm:$0xff] %vm125_vm3, %v592_v26 }
 0x2e8   :  { %v594_v34 = vpop.permute.xlu1 %593  ;;  %v596_v36 = vpop.permute.xlu0 %595 }
 0x2e9   :  { %604 = vst.msk [vmem:[#allocation2 + $0xb] sm:$0xff] %vm125_vm3, %v594_v34  ;;  %605 = vst.msk [vmem:[#allocation2 + $0x1b] sm:$0xff] %vm125_vm3, %v596_v36 }
 0x2ec   :  { %v598_v39 = vpop.permute.xlu1 %597  ;;  %v1243_v40 = vld [vmem:[#allocation2] sm:$0xff] }
 0x2ed   :  { %606 = vst.msk [vmem:[#allocation2 + $0x23] sm:$0xff] %vm125_vm3, %v598_v39  ;;  %v619_v30 = vmul.f32 %v618_v37, %v1243_v40  ;;  %v1254_v45 = vld [vmem:[#allocation2 + $0x3] sm:$0xff]  ;;  %v645_v60 = vmul.f32 %v644_v47, %v1243_v40  ;;  %v613_v11 = vmul.f32 %v612_v12, %v1243_v40 }
 0x2ee   :  { %v681_v57 = vmul.f32 %v680_v48, %v1254_v45  ;;  %v707_v16 = vmul.f32 %v706_v63, %v1254_v45  ;;  %v675_v26 = vmul.f32 %v674_v33, %v1254_v45 }
 0x2ef   :  { %627 = vrot.lane.b32.xlu0 %v619_v30, %s1003_s2  ;;  %v736_v30 = vstv %s878_s19 }
 0x2f0   :  { %v1248_v38 = vld [vmem:[#allocation2 + $0x8] sm:$0xff]  ;;  %v1250_v41 = vld [vmem:[#allocation2 + $0x18] sm:$0xff] }
 0x2f1   :  { %v620_v42 = vmul.f32 %v618_v37, %v1248_v38  ;;  %v621_v43 = vmul.f32 %v618_v37, %v1250_v41  ;;  %v1262_v59 = vld [vmem:[#allocation2 + $0xb] sm:$0xff]  ;;  %v1264_v0 = vld [vmem:[#allocation2 + $0x1b] sm:$0xff]  ;;  %v646_v14 = vmul.f32 %v644_v47, %v1248_v38  ;;  %v647_v15 = vmul.f32 %v644_v47, %v1250_v41 }
 0x2f2   :  { %v682_v2 = vmul.f32 %v680_v48, %v1262_v59  ;;  %v683_v56 = vmul.f32 %v680_v48, %v1264_v0  ;;  %v1272_v50 = vld [vmem:[#allocation2 + $0x6] sm:$0xff]  ;;  %v1278_v51 = vld [vmem:[#allocation2 + $0xe] sm:$0xff]  ;;  %v708_v17 = vmul.f32 %v706_v63, %v1262_v59  ;;  %v709_v4 = vmul.f32 %v706_v63, %v1264_v0 }
 0x2f3   :  { %629 = vrot.lane.b32.xlu1 %v620_v42, %s1003_s2  ;;  %631 = vrot.lane.b32.xlu0 %v621_v43, %s1003_s2  ;;  %v743_v44 = vmul.f32 %v742_v52, %v1272_v50  ;;  %v744_v5 = vmul.f32 %v742_v52, %v1278_v51  ;;  %v769_v3 = vmul.f32 %v768_v18, %v1272_v50 }
 0x2f4   :  { %v1258_v49 = vld [vmem:[#allocation2 + $0x20] sm:$0xff]  ;;  %v770_v19 = vmul.f32 %v768_v18, %v1278_v51  ;;  %v615_v39 = vmul.f32 %v612_v12, %v1250_v41  ;;  %v737_v41 = vmul.f32 %v736_v30, %v1272_v50 }
 0x2f5   :  { %v622_v53 = vmul.f32 %v618_v37, %v1258_v49  ;;  %v1270_v8 = vld [vmem:[#allocation2 + $0x23] sm:$0xff]  ;;  %v648_v54 = vmul.f32 %v644_v47, %v1258_v49  ;;  %v614_v37 = vmul.f32 %v612_v12, %v1248_v38 }
 0x2f6   :  { %v684_v1 = vmul.f32 %v680_v48, %v1270_v8  ;;  %v1280_v62 = vld [vmem:[#allocation2 + $0x1e] sm:$0xff]  ;;  %v1286_v13 = vld [vmem:[#allocation2 + $0x26] sm:$0xff]  ;;  %v710_v9 = vmul.f32 %v706_v63, %v1270_v8  ;;  %v676_v48 = vmul.f32 %v674_v33, %v1262_v59  ;;  %v678_v38 = vmul.f32 %v674_v33, %v1270_v8 }
 0x2f7   :  { %633 = vrot.lane.b32.xlu1 %v622_v53, %s1003_s2  ;;  %689 = vrot.lane.b32.xlu0 %v681_v57, %s1003_s2  ;;  %v745_v46 = vmul.f32 %v742_v52, %v1280_v62  ;;  %v746_v61 = vmul.f32 %v742_v52, %v1286_v13  ;;  %v771_v7 = vmul.f32 %v768_v18, %v1280_v62 }
 0x2f8   :  { %v772_v20 = vmul.f32 %v768_v18, %v1286_v13  ;;  %v677_v53 = vmul.f32 %v674_v33, %v1264_v0  ;;  %v739_v8 = vmul.f32 %v736_v30, %v1280_v62 }
 0x2fb   :  { %691 = vrot.lane.b32.xlu1 %v682_v2, %s1003_s2  ;;  %693 = vrot.lane.b32.xlu0 %v683_v56, %s1003_s2 }
 0x2ff   :  { %695 = vrot.lane.b32.xlu1 %v684_v1, %s1003_s2  ;;  %751 = vrot.lane.b32.xlu0 %v743_v44, %s1003_s2  ;;  %v616_v44 = vmul.f32 %v612_v12, %v1258_v49 }
 0x303   :  { %753 = vrot.lane.b32.xlu1 %v744_v5, %s1003_s2  ;;  %755 = vrot.lane.b32.xlu0 %v745_v46, %s1003_s2 }
 0x307   :  { %757 = vrot.lane.b32.xlu1 %v746_v61, %s1003_s2  ;;  %653 = vrot.lane.b32.xlu0 %v645_v60, %s1004_s15 }
 0x30b   :  { %655 = vrot.lane.b32.xlu1 %v646_v14, %s1004_s15  ;;  %657 = vrot.lane.b32.xlu0 %v647_v15, %s1004_s15 }
 0x30f   :  { %659 = vrot.lane.b32.xlu1 %v648_v54, %s1004_s15  ;;  %715 = vrot.lane.b32.xlu0 %v707_v16, %s1004_s15  ;;  %v738_v16 = vmul.f32 %v736_v30, %v1278_v51 }
 0x313   :  { %717 = vrot.lane.b32.xlu1 %v708_v17, %s1004_s15  ;;  %719 = vrot.lane.b32.xlu0 %v709_v4, %s1004_s15  ;;  %v798_v4 = vstv %s881_s20 }
 0x317   :  { %721 = vrot.lane.b32.xlu1 %v710_v9, %s1004_s15  ;;  %777 = vrot.lane.b32.xlu0 %v769_v3, %s1004_s15 }
 0x31b   :  { %779 = vrot.lane.b32.xlu1 %v770_v19, %s1004_s15  ;;  %781 = vrot.lane.b32.xlu0 %v771_v7, %s1004_s15 }
 0x31f   :  { %783 = vrot.lane.b32.xlu1 %v772_v20, %s1004_s15 }
 0x361   :  { %v628_v10 = vpop.permute.xlu0 %627 }
 0x362   :  { %v639_v34 = vadd.f32 %v628_v10, %v613_v11 }
 0x365   :  { %v630_v21 = vpop.permute.xlu1 %629  ;;  %v632_v22 = vpop.permute.xlu0 %631 }
 0x366   :  { %v640_v56 = vadd.f32 %v630_v21, %v614_v37  ;;  %v641_v40 = vadd.f32 %v632_v22, %v615_v39  ;;  %v740_v22 = vmul.f32 %v736_v30, %v1286_v13 }
 0x369   :  { %v634_v23 = vpop.permute.xlu1 %633  ;;  %v690_v6 = vpop.permute.xlu0 %689 }
 0x36a   :  { %v701_v36 = vadd.f32 %v690_v6, %v675_v26  ;;  %v642_v0 = vadd.f32 %v634_v23, %v616_v44 }
 0x36d   :  { %v692_v24 = vpop.permute.xlu1 %691  ;;  %v694_v25 = vpop.permute.xlu0 %693 }
 0x36e   :  { %v702_v52 = vadd.f32 %v692_v24, %v676_v48  ;;  %v703_v45 = vadd.f32 %v694_v25, %v677_v53 }
 0x371   :  { %v696_v27 = vpop.permute.xlu1 %695  ;;  %v752_v28 = vpop.permute.xlu0 %751 }
 0x372   :  { %v704_v14 = vadd.f32 %v696_v27, %v678_v38  ;;  %v763_v15 = vadd.f32 %v752_v28, %v737_v41 }
 0x375   :  { %v754_v29 = vpop.permute.xlu1 %753  ;;  %v756_v55 = vpop.permute.xlu0 %755 }
 0x376   :  { %v764_v3 = vadd.f32 %v754_v29, %v738_v16  ;;  %v765_v19 = vadd.f32 %v756_v55, %v739_v8 }
 0x379   :  { %v758_v31 = vpop.permute.xlu1 %757  ;;  %v654_v32 = vpop.permute.xlu0 %653 }
 0x37a   :  { %v665_v57 = vadd.f32 %v654_v32, %v639_v34  ;;  %v766_v51 = vadd.f32 %v758_v31, %v740_v22 }
 0x37d   :  { %v656_v58 = vpop.permute.xlu1 %655  ;;  %v658_v35 = vpop.permute.xlu0 %657 }
 0x37e   :  { %v666_v47 = vadd.f32 %v656_v58, %v640_v56  ;;  %v667_v61 = vadd.f32 %v658_v35, %v641_v40 }
 0x381   :  { %v660_v42 = vpop.permute.xlu1 %659  ;;  %v716_v43 = vpop.permute.xlu0 %715 }
 0x382   :  { %v727_v2 = vadd.f32 %v716_v43, %v701_v36  ;;  %v668_v18 = vadd.f32 %v660_v42, %v642_v0 }
 0x384   :  { %v793_v1 = vadd.f32 %v727_v2, %v665_v57 }
 0x385   :  { %v718_v5 = vpop.permute.xlu1 %717  ;;  %v720_v46 = vpop.permute.xlu0 %719 }
 0x386   :  { %v728_v59 = vadd.f32 %v718_v5, %v702_v52  ;;  %v729_v60 = vadd.f32 %v720_v46, %v703_v45 }
 0x388   :  { %v794_v63 = vadd.f32 %v728_v59, %v666_v47  ;;  %v795_v54 = vadd.f32 %v729_v60, %v667_v61 }
 0x389   :  { %v722_v17 = vpop.permute.xlu1 %721  ;;  %v778_v49 = vpop.permute.xlu0 %777 }
 0x38a   :  { %v730_v50 = vadd.f32 %v722_v17, %v704_v14  ;;  %v789_v9 = vadd.f32 %v778_v49, %v763_v15 }
 0x38c   :  { %v796_v7 = vadd.f32 %v730_v50, %v668_v18  ;;  %v799_v20 = vadd.f32 %v798_v4, %v789_v9 }
 0x38d   :  { %v780_v10 = vpop.permute.xlu1 %779  ;;  %v782_v21 = vpop.permute.xlu0 %781 }
 0x38e   :  { %v803_v23 = vadd.f32 %v799_v20, %v793_v1  ;;  %v790_v6 = vadd.f32 %v780_v10, %v764_v3  ;;  %v791_v24 = vadd.f32 %v782_v21, %v765_v19 }
 0x390   :  { %v882_v25 = vmul.f32 -1.442695, %v803_v23  ;;  %v800_v27 = vadd.f32 %v798_v4, %v790_v6  ;;  %v801_v28 = vadd.f32 %v798_v4, %v791_v24 }
 0x391   :  { %v784_v32 = vpop.permute.xlu1 %783 }
 0x392   :  { %901 = vpow2.f32 %v882_v25  ;;  %v804_v62 = vadd.f32 %v800_v27, %v794_v63  ;;  %v805_v12 = vadd.f32 %v801_v28, %v795_v54  ;;  %v792_v33 = vadd.f32 %v784_v32, %v766_v51 }
 0x394   :  { %v883_v29 = vmul.f32 -1.442695, %v804_v62  ;;  %v884_v55 = vmul.f32 -1.442695, %v805_v12  ;;  %v802_v58 = vadd.f32 %v798_v4, %v792_v33 }
 0x396   :  { %903 = vpow2.f32 %v883_v29  ;;  %v806_v35 = vadd.f32 %v802_v58, %v796_v7 }
 0x397   :  { %905 = vpow2.f32 %v884_v55 }
 0x398   :  { %v885_v11 = vmul.f32 -1.442695, %v806_v35 }
 0x39a   :  { %907 = vpow2.f32 %v885_v11 }
 0x39c   :  { %v902_v13 = vpop.eup %901 }
 0x39d   :  { %v819_v26 = vadd.f32 1.0, %v902_v13 }
 0x39f   :  { %909 = vrcp.f32 %v819_v26 }
 0x3a0   :  { %v904_v31 = vpop.eup %903 }
 0x3a1   :  { %v906_v34 = vpop.eup %905  ;;  %v820_v36 = vadd.f32 1.0, %v904_v31 }
 0x3a2   :  { %v821_v37 = vadd.f32 1.0, %v906_v34 }
 0x3a3   :  { %911 = vrcp.f32 %v820_v36 }
 0x3a4   :  { %v908_v39 = vpop.eup %907  ;;  %913 = vrcp.f32 %v821_v37 }
 0x3a5   :  { %v822_v30 = vadd.f32 1.0, %v908_v39 }
 0x3a7   :  { %915 = vrcp.f32 %v822_v30 }
 0x3a9   :  { %v910_v42 = vpop.eup %909 }
 0x3aa   :  { %831 = vst.msk [vmem:[#allocation10] sm:$0xff] %vm68_vm0, %v910_v42 }
 0x3ad   :  { %v912_v43 = vpop.eup %911 }
 0x3ae   :  { %v914_v48 = vpop.eup %913  ;;  %832 = vst.msk [vmem:[#allocation10 + $0x8] sm:$0xff] %vm68_vm0, %v912_v43 }
 0x3af   :  { %833 = vst.msk [vmem:[#allocation10 + $0x10] sm:$0xff] %vm68_vm0, %v914_v48 }
 0x3b1   :  { %v916_v53 = vpop.eup %915 }
 0x3b2   :  { %834 = vst.msk [vmem:[#allocation10 + $0x18] sm:$0xff] %vm68_vm0, %v916_v53 }
 0x3b3   :  { %972 = shalt.err (!%p969_p6)
}
 0x3b4   :  { %s973_s25 = scalar_lea.hbm %s1338_s3, 512 }
 0x3b5   :  { %p974_p7 = scmp.ne.s32.totalorder %s1338_s3, %s973_s25  ;;  %p977_p8 = scmp.lt.u32.totalorder %s973_s25, %s1338_s3 }
 0x3b7   :  { %p979_p9 = pnand %p977_p8, %p974_p7 }
 0x3b9   :  { %982 = shalt.err (!%p979_p9)
}
 0x3ba   :  { %846 = dma.vmem_to_hbm [thread:$0]  %s841_s22, 512, %s1338_s3, [#allocation5], %s994_s8, %s994_s8, %s995_s9  }
 0x3bb   :  { %989 = dma.done.wait [#allocation5], 512  }
 0x3bc   :  { %990 = vsyncadd [#allocation5], 4294966784 }
 0x3bd   :  { %850 = vsyncpa [#allocation4], 1 }
 0x3be   :  { %851 = vsyncpa [#allocation5], 1 }
 0x3bf   :  { %852 = vsyncpa [#allocation6], 1 }
 0x3c0   :  { %853 = vsyncpa [#allocation7], 1 }

</bundles_post_ra>
